<compile_context>
chip_gen: v6e
topology: v6e:2x2x1
jax: 0.10.0
libtpu: 0.0.40
codegen_flags: <defaults>
</compile_context>

<pallas_src>
import functools

import jax
import jax.numpy as jnp
from jax import lax
from jax.experimental import pallas as pl
from jax.experimental.pallas import tpu as pltpu


def _round_up(x, m):
    return ((x + m - 1) // m) * m


def _reference(output1, output2, label, margin):
    """Pure-JAX reference mirroring the torch semantics (difference-based cdist)."""
    x1 = output1.astype(jnp.float32)
    x2 = output2.astype(jnp.float32)
    d = jnp.sqrt(jnp.maximum(
        jnp.sum((x1[:, None, :] - x2[None, :, :]) ** 2, axis=-1), 0.0))
    lab = jnp.asarray(label).reshape(-1, 1).astype(jnp.float32)
    loss = (1.0 - lab) * d ** 2 + lab * jnp.maximum(float(margin) - d, 0.0) ** 2
    return jnp.mean(loss)


def _contrastive_loss_kernel(flags_ref, x1_ref, x2n_ref, rowinfo_ref, sq2_ref,
                             out_ref, acc_ref, *, margin):
    i = pl.program_id(0)
    j = pl.program_id(1)

    # Per-row-tile accumulator: reset at the start of every grid row so axis 0
    # can be 'parallel' (each i owns an independent partial; finished in wrapper).
    @pl.when(j == 0)
    def _():
        acc_ref[...] = jnp.zeros_like(acc_ref)

    # (tn, D) x (tm, D) 'NT' contraction on the MXU, f32 accumulate.  x2 was
    # pre-scaled by -2 in the wrapper, so cross == -2 * x1.x2^T directly.
    cross = lax.dot_general(
        x1_ref[...], x2n_ref[...],
        dimension_numbers=(((1,), (1,)), ((), ())),
        preferred_element_type=jnp.float32)

    rowinfo = rowinfo_ref[...]              # (tn, 2) f32 = [||x1||^2, label]
    sq1 = rowinfo[:, 0:1]                   # (tn, 1)
    lab = rowinfo[:, 1:2]                   # (tn, 1), broadcasts over M

    # ||a-b||^2; the clamp both guards cancellation and collapses the
    # sentinel-padded rows/columns (sq = -1e30) to exactly 0 -> no edge masks.
    d2 = jnp.maximum(sq1 + sq2_ref[...] + cross, 0.0)

    def _accumulate(loss_tile):
        row_sum = jnp.sum(loss_tile, axis=1, keepdims=True)       # lane reduce
        acc_ref[...] += jnp.sum(row_sum, axis=0, keepdims=True)   # sublane reduce

    has_pos = flags_ref[i] != 0             # SMEM scalar (prefetched)

    @pl.when(has_pos)
    def _():
        d = jnp.sqrt(d2)                                          # EUP
        hinge = jnp.maximum(jnp.float32(margin) - d, 0.0)
        _accumulate((1.0 - lab) * d2 + lab * (hinge * hinge))     # reuse d2

    @pl.when(jnp.logical_not(has_pos))
    def _():
        # All labels in this row tile are exactly 0: loss == d2 (skip sqrt/hinge).
        _accumulate(d2)

    @pl.when(j == pl.num_programs(1) - 1)
    def _():
        out_ref[...] = acc_ref[...].reshape(1, 1, 1)


def contrastive_loss(output1, output2, label, margin, *,
                     tile_n=512, tile_m=1024, min_pallas_elements=8192):
    """output1: (N, D), output2: (M, D), label: (N, 1) or (N,) -> scalar mean loss."""
    n, d = output1.shape
    m, d2_ = output2.shape
    assert d == d2_, (output1.shape, output2.shape)
    label = jnp.asarray(label).reshape(n, 1).astype(jnp.float32)

    # Tiny problems: pallas_call launch overhead dwarfs the work.
    if n * m < min_pallas_elements:
        return _reference(output1, output2, label, margin)

    # vreg-aligned tiles: lane axis (M) multiple of 128, sublane axis (N)
    # multiple of 16 (covers the bf16 packed-sublane minimum as well as f32).
    tile_n = _round_up(max(16, min(tile_n, _round_up(n, 16))), 16)
    tile_m = _round_up(max(128, min(tile_m, _round_up(m, 128))), 128)
    n_pad = _round_up(n, tile_n)
    m_pad = _round_up(m, tile_m)
    ni, nj = n_pad // tile_n, m_pad // tile_m

    # Hoisted O(N*D)/O(M*D) wrapper work: f32 norms + fold of "-2" into x2.
    sq1 = jnp.sum(jnp.square(output1.astype(jnp.float32)), axis=-1, keepdims=True)    # (N, 1)
    sq2 = jnp.sum(jnp.square(output2.astype(jnp.float32)), axis=-1, keepdims=True).T  # (1, M)
    x1 = output1
    x2n = output2 * jnp.asarray(-2.0, output2.dtype)     # exact pow-2 scale (bf16-safe)

    # Sentinel padding: padded rows/cols get sq = -1e30 so d2 == 0 there; padded
    # labels are 0.  The only spurious contribution is label*margin^2 on padded
    # columns, removed analytically below -> kernel needs no edge masking.
    if n_pad != n:
        x1 = jnp.pad(x1, ((0, n_pad - n), (0, 0)))
        sq1 = jnp.pad(sq1, ((0, n_pad - n), (0, 0)), constant_values=-1e30)
        lab_p = jnp.pad(label, ((0, n_pad - n), (0, 0)))
    else:
        lab_p = label
    if m_pad != m:
        x2n = jnp.pad(x2n, ((0, m_pad - m), (0, 0)))
        sq2 = jnp.pad(sq2, ((0, 0), (0, m_pad - m)), constant_values=-1e30)

    rowinfo = jnp.concatenate([sq1, lab_p], axis=1)                         # (n_pad, 2)
    flags = jnp.any(lab_p.reshape(ni, tile_n) != 0, axis=1).astype(jnp.int32)  # (ni,)

    # VMEM budget: double-buffered inputs + live f32 intermediates; cap under
    # v7x's 64 MiB physical ceiling (v5e/v6e have 128 MiB, so safe everywhere),
    # raise the 32 MiB scoped default when larger tiles need it.
    itemsize = jnp.dtype(output1.dtype).itemsize
    est = (2 * tile_n * d * itemsize + 2 * tile_m * d * itemsize
           + 2 * tile_n * 128 * 4 + 2 * 8 * tile_m * 4
           + 10 * tile_n * tile_m * 4 + (1 << 20))
    vmem_limit = int(min(max(est, 32 * 1024 * 1024), 56 * 1024 * 1024))

    kernel = functools.partial(_contrastive_loss_kernel, margin=float(margin))

    partials = pl.pallas_call(
        kernel,
        out_shape=jax.ShapeDtypeStruct((ni, 1, 1), jnp.float32),
        grid_spec=pltpu.PrefetchScalarGridSpec(
            num_scalar_prefetch=1,                 # per-row-tile "any positive" flags (SMEM)
            grid=(ni, nj),
            in_specs=[
                pl.BlockSpec((tile_n, d), lambda i, j, flags: (i, 0)),   # x1      (N, D)
                pl.BlockSpec((tile_m, d), lambda i, j, flags: (j, 0)),   # -2*x2   (M, D)
                pl.BlockSpec((tile_n, 2), lambda i, j, flags: (i, 0)),   # [sq1, label] (N, 2)
                pl.BlockSpec((1, tile_m), lambda i, j, flags: (0, j)),   # sq2     (1, M), lane-dense
            ],
            out_specs=pl.BlockSpec((1, 1, 1), lambda i, j, flags: (i, 0, 0)),
            scratch_shapes=[pltpu.VMEM((1, 1), jnp.float32)],            # per-row-tile accumulator
        ),
        compiler_params=pltpu.CompilerParams(
            # i axis carries independent per-row-tile partials -> megacore-shardable
            # on v7x; j is the in-core reduction axis.
            dimension_semantics=("parallel", "arbitrary"),
            vmem_limit_bytes=vmem_limit),
    )(flags, x1, x2n, rowinfo, sq2)

    total = jnp.sum(partials)
    if m_pad != m:
        # Remove the known label*margin^2 contribution of the padded columns.
        total = total - (max(float(margin), 0.0) ** 2) * float(m_pad - m) * jnp.sum(label)
    return total / jnp.float32(n * m)


if __name__ == "__main__":
    key = jax.random.PRNGKey(0)
    k1, k2, k3 = jax.random.split(key, 3)

    N, M, D = 136, 272, 32          # multi-tile grid + sentinel padding + correction
    margin = 2.0

    output1 = jax.random.normal(k1, (N, D), dtype=jnp.float32)
    output2 = jax.random.normal(k2, (M, D), dtype=jnp.float32)
    label = jax.random.bernoulli(k3, 0.5, (N, 1)).astype(jnp.float32)

    # f32 path: 3x3 grid of (64, 128) tiles, padded rows + padded columns.
    loss = contrastive_loss(output1, output2, label, margin, tile_n=64, tile_m=128)
    jax.block_until_ready(loss)
    ref = _reference(output1, output2, label, margin)
    assert jnp.allclose(loss, ref, rtol=1e-4, atol=1e-5), (loss, ref)

    # All-negative labels: exercises the flag-gated "loss = d2" fast path.
    zeros = jnp.zeros((N, 1), jnp.float32)
    loss0 = contrastive_loss(output1, output2, zeros, margin, tile_n=64, tile_m=128)
    jax.block_until_ready(loss0)
    ref0 = _reference(output1, output2, zeros, margin)
    assert jnp.allclose(loss0, ref0, rtol=1e-4, atol=1e-5), (loss0, ref0)

    # bf16 inputs straight into the MXU (f32 accumulate, f32 norms from wrapper).
    loss_bf16 = contrastive_loss(output1.astype(jnp.bfloat16),
                                 output2.astype(jnp.bfloat16),
                                 label, margin, tile_n=64, tile_m=128)
    jax.block_until_ready(loss_bf16)
    ref_bf16 = _reference(output1.astype(jnp.bfloat16),
                          output2.astype(jnp.bfloat16), label, margin)
    assert jnp.allclose(loss_bf16, ref_bf16, rtol=5e-2, atol=5e-2), (loss_bf16, ref_bf16)

    print("KERNEL_OK")
</pallas_src>

<mosaic_0001>
module attributes {stable_mosaic.version = 11 : i64} {
  func.func @_contrastive_loss_kernel(%arg0: i32, %arg1: i32, %arg2: memref<3xi32, #tpu.memory_space<smem>>, %arg3: memref<64x32xf32, #tpu.memory_space<vmem>>, %arg4: memref<128x32xf32, #tpu.memory_space<vmem>>, %arg5: memref<64x2xf32, #tpu.memory_space<vmem>>, %arg6: memref<1x128xf32, #tpu.memory_space<vmem>>, %arg7: memref<1x1x1xf32, #tpu.memory_space<vmem>>, %arg8: memref<1x1xf32, #tpu.memory_space<vmem>>) attributes {dimension_semantics = [#tpu.dimension_semantics<parallel>, #tpu.dimension_semantics<arbitrary>], iteration_bounds = array<i64: 3, 3>, scalar_prefetch = 1 : i64, scratch_operands = 1 : i64, tpu.core_type = #tpu.core_type<tc>, window_params = [{transform_indices = @transform_0, window_bounds = array<i64: 64, 32>}, {transform_indices = @transform_1, window_bounds = array<i64: 128, 32>}, {transform_indices = @transform_2, window_bounds = array<i64: 64, 2>}, {transform_indices = @transform_3, window_bounds = array<i64: 1, 128>}, {transform_indices = @transform_4, window_bounds = array<i64: 1, 1, 1>}]} {
    %c0_i32 = arith.constant 0 : i32
    %0 = arith.cmpi eq, %arg1, %c0_i32 : i32
    %1 = arith.extui %0 : i1 to i32
    %c0_i32_0 = arith.constant 0 : i32
    %2 = arith.cmpi ne, %1, %c0_i32_0 : i32
    scf.if %2 {
      %cst_13 = arith.constant 0.000000e+00 : f32
      %27 = vector.broadcast %cst_13 : f32 to vector<1x1xf32>
      %c0_14 = arith.constant 0 : index
      %c0_15 = arith.constant 0 : index
      %28 = vector.load %arg8[%c0_14, %c0_15] : memref<1x1xf32, #tpu.memory_space<vmem>>, vector<1x1xf32>
      tpu.vector_store %arg8[%c0_14, %c0_15], %27 {strides = array<i32>} : memref<1x1xf32, #tpu.memory_space<vmem>>, vector<1x1xf32>,
    } else {
    }
    %c0 = arith.constant 0 : index
    %c0_1 = arith.constant 0 : index
    %3 = vector.load %arg3[%c0, %c0_1] : memref<64x32xf32, #tpu.memory_space<vmem>>, vector<64x32xf32>
    %c0_2 = arith.constant 0 : index
    %c0_3 = arith.constant 0 : index
    %4 = vector.load %arg4[%c0_2, %c0_3] : memref<128x32xf32, #tpu.memory_space<vmem>>, vector<128x32xf32>
    %cst = arith.constant dense<0.000000e+00> : vector<64x128xf32>
    %5 = tpu.matmul %3, %4, %cst {dimension_numbers = #tpu.dot_dimension_numbers<[1], [1], [0], [0], [0, 0, 1, 0], [], []>} : vector<64x32xf32>, vector<128x32xf32>, vector<64x128xf32> -> vector<64x128xf32>
    %c0_4 = arith.constant 0 : index
    %c0_5 = arith.constant 0 : index
    %6 = vector.load %arg5[%c0_4, %c0_5] : memref<64x2xf32, #tpu.memory_space<vmem>>, vector<64x2xf32>
    %7 = vector.extract_strided_slice %6 {offsets = [0, 0], sizes = [64, 1], strides = [1, 1]} : vector<64x2xf32> to vector<64x1xf32>
    %8 = vector.extract_strided_slice %6 {offsets = [0, 1], sizes = [64, 1], strides = [1, 1]} : vector<64x2xf32> to vector<64x1xf32>
    %c0_6 = arith.constant 0 : index
    %c0_7 = arith.constant 0 : index
    %9 = vector.load %arg6[%c0_6, %c0_7] : memref<1x128xf32, #tpu.memory_space<vmem>>, vector<1x128xf32>
    %10 = vector.broadcast %7 : vector<64x1xf32> to vector<64x128xf32>
    %11 = vector.broadcast %9 : vector<1x128xf32> to vector<64x128xf32>
    %12 = arith.addf %10, %11 : vector<64x128xf32>
    %13 = arith.addf %12, %5 : vector<64x128xf32>
    %cst_8 = arith.constant 0.000000e+00 : f32
    %14 = vector.broadcast %cst_8 : f32 to vector<64x128xf32>
    %15 = arith.maximumf %13, %14 : vector<64x128xf32>
    %16 = arith.index_cast %arg0 : i32 to index
    %17 = memref.load %arg2[%16] : memref<3xi32, #tpu.memory_space<smem>>
    %c0_i32_9 = arith.constant 0 : i32
    %18 = arith.cmpi ne, %17, %c0_i32_9 : i32
    %19 = arith.extui %18 : i1 to i32
    %c0_i32_10 = arith.constant 0 : i32
    %20 = arith.cmpi ne, %19, %c0_i32_10 : i32
    scf.if %20 {
      %27 = math.sqrt %15 : vector<64x128xf32>
      %cst_13 = arith.constant 2.000000e+00 : f32
      %28 = vector.broadcast %cst_13 : f32 to vector<64x128xf32>
      %29 = arith.subf %28, %27 : vector<64x128xf32>
      %cst_14 = arith.constant 0.000000e+00 : f32
      %30 = vector.broadcast %cst_14 : f32 to vector<64x128xf32>
      %31 = arith.maximumf %29, %30 : vector<64x128xf32>
      %cst_15 = arith.constant 1.000000e+00 : f32
      %32 = vector.broadcast %cst_15 : f32 to vector<64x1xf32>
      %33 = arith.subf %32, %8 : vector<64x1xf32>
      %34 = vector.broadcast %33 : vector<64x1xf32> to vector<64x128xf32>
      %35 = arith.mulf %34, %15 : vector<64x128xf32>
      %36 = arith.mulf %31, %31 : vector<64x128xf32>
      %37 = vector.broadcast %8 : vector<64x1xf32> to vector<64x128xf32>
      %38 = arith.mulf %37, %36 : vector<64x128xf32>
      %39 = arith.addf %35, %38 : vector<64x128xf32>
      %cst_16 = arith.constant dense<0.000000e+00> : vector<64xf32>
      %40 = vector.multi_reduction <add>, %39, %cst_16 [1] : vector<64x128xf32> to vector<64xf32>
      %41 = vector.shape_cast %40 : vector<64xf32> to vector<64x1xf32>
      %c0_17 = arith.constant 0 : index
      %c0_18 = arith.constant 0 : index
      %42 = vector.load %arg8[%c0_17, %c0_18] : memref<1x1xf32, #tpu.memory_space<vmem>>, vector<1x1xf32>
      %cst_19 = arith.constant dense<0.000000e+00> : vector<1xf32>
      %43 = vector.multi_reduction <add>, %41, %cst_19 [0] : vector<64x1xf32> to vector<1xf32>
      %44 = vector.shape_cast %43 : vector<1xf32> to vector<1x1xf32>
      %45 = arith.addf %42, %44 : vector<1x1xf32>
      %c0_20 = arith.constant 0 : index
      %c0_21 = arith.constant 0 : index
      %46 = vector.load %arg8[%c0_20, %c0_21] : memref<1x1xf32, #tpu.memory_space<vmem>>, vector<1x1xf32>
      tpu.vector_store %arg8[%c0_20, %c0_21], %45 {strides = array<i32>} : memref<1x1xf32, #tpu.memory_space<vmem>>, vector<1x1xf32>,
    } else {
    }
    %true = arith.constant true
    %21 = arith.xori %18, %true : i1
    %22 = arith.extui %21 : i1 to i32
    %c0_i32_11 = arith.constant 0 : i32
    %23 = arith.cmpi ne, %22, %c0_i32_11 : i32
    scf.if %23 {
      %cst_13 = arith.constant dense<0.000000e+00> : vector<64xf32>
      %27 = vector.multi_reduction <add>, %15, %cst_13 [1] : vector<64x128xf32> to vector<64xf32>
      %28 = vector.shape_cast %27 : vector<64xf32> to vector<64x1xf32>
      %c0_14 = arith.constant 0 : index
      %c0_15 = arith.constant 0 : index
      %29 = vector.load %arg8[%c0_14, %c0_15] : memref<1x1xf32, #tpu.memory_space<vmem>>, vector<1x1xf32>
      %cst_16 = arith.constant dense<0.000000e+00> : vector<1xf32>
      %30 = vector.multi_reduction <add>, %28, %cst_16 [0] : vector<64x1xf32> to vector<1xf32>
      %31 = vector.shape_cast %30 : vector<1xf32> to vector<1x1xf32>
      %32 = arith.addf %29, %31 : vector<1x1xf32>
      %c0_17 = arith.constant 0 : index
      %c0_18 = arith.constant 0 : index
      %33 = vector.load %arg8[%c0_17, %c0_18] : memref<1x1xf32, #tpu.memory_space<vmem>>, vector<1x1xf32>
      tpu.vector_store %arg8[%c0_17, %c0_18], %32 {strides = array<i32>} : memref<1x1xf32, #tpu.memory_space<vmem>>, vector<1x1xf32>,
    } else {
    }
    %c2_i32 = arith.constant 2 : i32
    %24 = arith.cmpi eq, %arg1, %c2_i32 : i32
    %25 = arith.extui %24 : i1 to i32
    %c0_i32_12 = arith.constant 0 : i32
    %26 = arith.cmpi ne, %25, %c0_i32_12 : i32
    scf.if %26 {
      %c0_13 = arith.constant 0 : index
      %c0_14 = arith.constant 0 : index
      %27 = vector.load %arg8[%c0_13, %c0_14] : memref<1x1xf32, #tpu.memory_space<vmem>>, vector<1x1xf32>
      %28 = vector.shape_cast %27 : vector<1x1xf32> to vector<1x1x1xf32>
      %c0_15 = arith.constant 0 : index
      %c0_16 = arith.constant 0 : index
      %c0_17 = arith.constant 0 : index
      %29 = vector.load %arg7[%c0_15, %c0_16, %c0_17] : memref<1x1x1xf32, #tpu.memory_space<vmem>>, vector<1x1x1xf32>
      tpu.vector_store %arg7[%c0_15, %c0_16, %c0_17], %28 {strides = array<i32>} : memref<1x1x1xf32, #tpu.memory_space<vmem>>, vector<1x1x1xf32>,
    } else {
    }
    return
  }
  func.func @transform_0(%arg0: i32, %arg1: i32, %arg2: memref<3xi32, #tpu.memory_space<smem>>) -> (i32, i32) {
    %c0_i32 = arith.constant 0 : i32
    %c0_i32_0 = arith.constant 0 : i32
    return %arg0, %c0_i32 : i32, i32
  }
  func.func @transform_1(%arg0: i32, %arg1: i32, %arg2: memref<3xi32, #tpu.memory_space<smem>>) -> (i32, i32) {
    %c0_i32 = arith.constant 0 : i32
    %c0_i32_0 = arith.constant 0 : i32
    return %arg1, %c0_i32 : i32, i32
  }
  func.func @transform_2(%arg0: i32, %arg1: i32, %arg2: memref<3xi32, #tpu.memory_space<smem>>) -> (i32, i32) {
    %c0_i32 = arith.constant 0 : i32
    %c0_i32_0 = arith.constant 0 : i32
    return %arg0, %c0_i32 : i32, i32
  }
  func.func @transform_3(%arg0: i32, %arg1: i32, %arg2: memref<3xi32, #tpu.memory_space<smem>>) -> (i32, i32) {
    %c0_i32 = arith.constant 0 : i32
    %c0_i32_0 = arith.constant 0 : i32
    return %c0_i32, %arg1 : i32, i32
  }
  func.func @transform_4(%arg0: i32, %arg1: i32, %arg2: memref<3xi32, #tpu.memory_space<smem>>) -> (i32, i32, i32) {
    %c0_i32 = arith.constant 0 : i32
    %c0_i32_0 = arith.constant 0 : i32
    %c0_i32_1 = arith.constant 0 : i32
    return %arg0, %c0_i32, %c0_i32_0 : i32, i32, i32
  }
}

</mosaic_0001>

<bundles_post_ra>
// kernel: tpu_custom_call.1
= control target key start
LH: loop header
LB: loop body
LE: loop exit
PB: predicated region body
PF: predicated region fallthrough
CT: control target
= control target key end

     0   :  { %s1537_s0 = inlined_call_operand.vmem [shape: s32[3], index: 0, kind: input, shape index: {}]   ;;  %s1538_s1 = inlined_call_operand.vmem [shape: f32[192,32], index: 1, kind: input, shape index: {}]   ;;  %s1539_s2 = inlined_call_operand.vmem [shape: f32[384,32], index: 2, kind: input, shape index: {}]   ;;  %s1540_s3 = inlined_call_operand.vmem [shape: f32[192,2], index: 3, kind: input, shape index: {}]   ;;  %s1541_s4 = inlined_call_operand.vmem [shape: f32[1,384], index: 4, kind: input, shape index: {}]   ;;  %s1542_s5 = inlined_call_operand.vmem [shape: f32[3,1,1], index: 5, kind: output, shape index: {}]  }
   0x1   :  { %s10_s20 = sshll.u32 %s1537_s0, 4  ;;  %s11_s20 = int_to_ptr.vmem [resolvable:$true] %s10_s20 }
   0x2   :  { %s1123_s21 = scalar_lea.vmem %s11_s20, 16  ;;  %p1128_p1 = scmp.lt.s32.totalorder %s11_s20, %s11_s20 }
   0x3   :  { %p1124_p0 = scmp.ne.s32.totalorder %s11_s20, %s1123_s21  ;;  %p1129_p2 = scmp.lt.s32.totalorder %s1123_s21, %s1123_s21 }
   0x5   :  { %p1130_p3 = por %p1129_p2, %p1128_p1 }
   0x7   :  { %p1131_p4 = pnand %p1130_p3, %p1124_p0 }
   0x9   :  { %1134 = shalt.err (!%p1131_p4)  }
   0xa   :  { %s1177_s22 = smov [#allocation4]  }
   0xb   :  { %13 = dma.vmem_to_smem %s11_s20, 16, %s1177_s22, [#allocation3] }
   0xc   :  { %1155 = dma.done.wait [#allocation3], 16 }
   0xd   :  { %1156 = vsyncadd [#allocation3], 4294967280 }
   0xe   :  { %15 = sfence }
   0xf   :  { %s1214_s23 = smov 0   ;;  %s1216_s24 = smov 0  }
  0x10   :  { %s1218_s25 = smov 0   ;;  %s1220_s0 = smov 0  }
  0x11   :  { %s1222_s26 = smov 0  }
  0x12 LB: > { %s30_s27 = sadd.s32 1, %s1167_s25  ;;  %s33_s28 = sadd.s32 1, %s1171_s0  ;;  %s1175_s26 = sphi %s1222_s26, %s21_s26   ;;  %s1171_s0 = sphi %s1220_s0, %s1546_s0   ;;  %s1167_s25 = sphi %s1218_s25, %s1545_s25   ;;  %s1163_s24 = sphi %s1216_s24, %s1544_s24   ;;  %s1159_s23 = sphi %s1214_s23, %s1543_s23  }
  0x13   : > { %p31_p5 = scmp.ge.s32.totalorder %s30_s27, 3  ;;  %p921_p6 = scmp.ge.s32.totalorder %s1175_s26, 1 }
  0x14   : > { %p212_p7 = scmp.lt.s32.totalorder %s1175_s26, 10 }
  0x15   : > { %s1548_s27 = smov (%p31_p5, %s30_s27), 0  ;;  %s1550_s28 = smov (!%p31_p5, %s33_s28), %s1171_s0 }
  0x16   : > { %p213_p8 = pnand %p921_p6, %p212_p7  ;;  %p35_p9 = scmp.ge.s32.totalorder %s1550_s28, 3 }
  0x17   : > { %s922_s29 = sshll.u32 (!%p213_p8), %s1163_s24, 3  ;;  %s924_s30 = sshll.u32 (!%p213_p8), %s1159_s23, 4 }
  0x18   : > { %s1552_s28 = smov (%p35_p9, %s1550_s28), 0  ;;  %216 = sbr.rel (%p213_p8) target bundleno = 806 (0x326), region = 36 }
  0x19   : > { %p250_p10 = scmp.lt.s32.totalorder (!%p213_p8), %s922_s29, 23  ;;  %p256_p11 = scmp.lt.s32.totalorder (!%p213_p8), %s924_s30, 47 }
  0x1a   : > { %p267_p12 = scmp.lt.s32.totalorder (!%p213_p8), %s1159_s23, 2  ;;  %p270_p13 = scmp.lt.s32.totalorder (!%p213_p8), %s1163_s24, 2 }
  0x1b   : > { %p928_p0 = scmp.ne.s32.totalorder (!%p213_p8), %s1159_s23, 0 }
  0x1d   : > { %s1554_s29 = smov (!%p250_p10, %s922_s29), 23  ;;  %s1556_s30 = smov (!%p256_p11, %s924_s30), 47 }
  0x1e   : > { %s923_s6 = sshll.u32 %s1554_s29, 3  ;;  %s925_s10 = sshll.u32 %s1556_s30, 3 }
  0x1f   : > { %s1255_s9 = scalar_lea.vmem %s1538_s1, %s923_s6  ;;  %s1260_s13 = scalar_lea.vmem %s1539_s2, %s925_s10 }
  0x20   : > { %s1265_s16 = scalar_lea.vmem %s1540_s3, %s923_s6  ;;  %276 = sbr.rel (%p928_p0) target bundleno = 39 (0x27), region = 40 }
  0x21   : > { %s1268_s17 = scalar_select %p267_p12, %s1159_s23, 2 }
  0x22   : > { %s1271_s18 = scalar_select %p270_p13, %s1163_s24, 2 }
  0x23   : > { %s269_s21 = scalar_lea.vmem %s1541_s4, %s1268_s17 }
  0x24   : > { %s272_s30 = scalar_lea.vmem %s1542_s5, %s1271_s18 }
  0x25   : > { %vm277_vm0 = vcmask 0   ;;  %v1178_v0 = vmov 0.0  }
  0x26   : > { %278 = vst.msk [vmem:[#allocation2] sm:$0x1] %vm277_vm0, %v1178_v0 }
  0x27 PF: > { %v302_v1 = vld [vmem:[%s1260_s13 + $0x78] sm:$0xff]  ;;  %vm303_vm1 = vcmask 261120   ;;  %v301_v2 = vld [vmem:[%s1260_s13 + $0x70] sm:$0xff]  ;;  %v300_v3 = vld [vmem:[%s1260_s13 + $0x68] sm:$0xff]  ;;  %v1179_v4 = vmov 0   ;;  %s1411_s6 = sld [smem:[#allocation4 + %s1163_s24]] }
  0x28   : > { %983 = vmatprep.subr.msk.mxu0 %vm303_vm1, %v302_v1  ;;  %1027 = vmatprep.subr.msk.mxu1 %vm303_vm1, %v302_v1  ;;  %v279_v5 = vld [vmem:[%s1255_s9] sm:$0xff]  ;;  %v1301_v8 = vld [vmem:[%s1265_s16 + $0x10] sm:$0xff]  ;;  %v1311_v10 = vld [vmem:[%s1265_s16 + $0x18] sm:$0xff] }
  0x29   : > { %984 = vmatpush3.xpose.msk.msra.mxu0 %vm303_vm1, %v302_v1  ;;  %1043 = vmatpush3.xpose.msk.msra.mxu1 %vm303_vm1, %v302_v1  ;;  %v283_v6 = vld [vmem:[%s1255_s9 + $0x20] sm:$0xff]  ;;  %v1314_v11 = vld [vmem:[%s1265_s16 + $0x8] sm:$0xff]  ;;  %v298_v12 = vld [vmem:[%s1260_s13 + $0x58] sm:$0xff] }
  0x2a   : > { %985 = vmatprep.subr.msk.mxu0 %vm303_vm1, %v301_v2  ;;  %1028 = vmatprep.subr.msk.mxu1 %vm303_vm1, %v301_v2  ;;  %v299_v7 = vld [vmem:[%s1260_s13 + $0x60] sm:$0xff]  ;;  %v1324_v13 = vld [vmem:[%s1265_s16 + $0x28] sm:$0xff]  ;;  %v297_v15 = vld [vmem:[%s1260_s13 + $0x50] sm:$0xff] }
  0x2b   : > { %1104 = vset.pattern.permute.xlu1 %v1179_v4  ;;  %1103 = vset.pattern.permute.xlu0 %v1179_v4  ;;  %v1304_v9 = vld [vmem:[%s1265_s16] sm:$0xff]  ;;  %v1337_v16 = vld [vmem:[%s1265_s16 + $0x38] sm:$0xff]  ;;  %v1340_v17 = vld [vmem:[%s1265_s16 + $0x30] sm:$0xff] }
  0x2c   : > { %1015 = vmatprep.mubr.msk.f32.mxu0 %vm303_vm1, %v279_v5  ;;  %1021 = vmatprep.mubr.msk.f32.mxu1 %vm303_vm1, %v283_v6  ;;  %v1327_v14 = vld [vmem:[%s1265_s16 + $0x20] sm:$0xff]  ;;  %v296_v18 = vld [vmem:[%s1260_s13 + $0x48] sm:$0xff]  ;;  %v294_v20 = vld [vmem:[%s1260_s13 + $0x38] sm:$0xff] }
  0x2d   : > { %986 = vmatpush3.xpose.msk.msra.mxu0 %vm303_vm1, %v301_v2  ;;  %1044 = vmatpush3.xpose.msk.msra.mxu1 %vm303_vm1, %v301_v2  ;;  %v295_v19 = vld [vmem:[%s1260_s13 + $0x40] sm:$0xff]  ;;  %v293_v21 = vld [vmem:[%s1260_s13 + $0x30] sm:$0xff]  ;;  %v292_v22 = vld [vmem:[%s1260_s13 + $0x28] sm:$0xff]  ;;  %p954_p1 = scmp.eq.s32.totalorder %s1411_s6, 0 }
  0x2e   : > { %987 = vmatprep.subr.msk.mxu0 %vm303_vm1, %v300_v3  ;;  %1029 = vmatprep.subr.msk.mxu1 %vm303_vm1, %v300_v3  ;;  %v291_v23 = vld [vmem:[%s1260_s13 + $0x20] sm:$0xff]  ;;  %v290_v24 = vld [vmem:[%s1260_s13 + $0x18] sm:$0xff]  ;;  %v289_v25 = vld [vmem:[%s1260_s13 + $0x10] sm:$0xff] }
  0x2f   : > { %502 = vperm.xlu1 %1104, %v1301_v8   ;;  %492 = vperm.xlu0 %1103, %v1304_v9   ;;  %v288_v26 = vld [vmem:[%s1260_s13 + $0x8] sm:$0xff]  ;;  %v287_v27 = vld [vmem:[%s1260_s13] sm:$0xff]  ;;  %v281_v30 = vld [vmem:[%s1255_s9 + $0x10] sm:$0xff] }
  0x30   : > { %v280_v28 = vld [vmem:[%s1255_s9 + $0x8] sm:$0xff]  ;;  %v285_v31 = vld [vmem:[%s1255_s9 + $0x30] sm:$0xff]  ;;  %v282_v32 = vld [vmem:[%s1255_s9 + $0x18] sm:$0xff] }
  0x31   : > { %988 = vmatpush3.xpose.msk.msra.mxu0 %vm303_vm1, %v300_v3  ;;  %1045 = vmatpush3.xpose.msk.msra.mxu1 %vm303_vm1, %v300_v3  ;;  %v284_v29 = vld [vmem:[%s1255_s9 + $0x28] sm:$0xff]  ;;  %v286_v33 = vld [vmem:[%s1255_s9 + $0x38] sm:$0xff]  ;;  %v953_v40 = vld [vmem:[%s269_s21] ss:$0 sm:$0xff] }
  0x32   : > { %989 = vmatprep.subr.msk.mxu0 %vm303_vm1, %v299_v7  ;;  %1030 = vmatprep.subr.msk.mxu1 %vm303_vm1, %v299_v7 }
  0x33   : > { %507 = vperm.xlu1 %1104, %v1311_v10   ;;  %497 = vperm.xlu0 %1103, %v1314_v11  }
  0x35   : > { %990 = vmatpush3.xpose.msk.msra.mxu0 %vm303_vm1, %v299_v7  ;;  %1046 = vmatpush3.xpose.msk.msra.mxu1 %vm303_vm1, %v299_v7 }
  0x36   : > { %991 = vmatprep.subr.msk.mxu0 %vm303_vm1, %v298_v12  ;;  %1031 = vmatprep.subr.msk.mxu1 %vm303_vm1, %v298_v12 }
  0x37   : > { %517 = vperm.xlu1 %1104, %v1324_v13   ;;  %512 = vperm.xlu0 %1103, %v1327_v14  }
  0x39   : > { %992 = vmatpush3.xpose.msk.msra.mxu0 %vm303_vm1, %v298_v12  ;;  %1047 = vmatpush3.xpose.msk.msra.mxu1 %vm303_vm1, %v298_v12 }
  0x3a   : > { %993 = vmatprep.subr.msk.mxu0 %vm303_vm1, %v297_v15  ;;  %1032 = vmatprep.subr.msk.mxu1 %vm303_vm1, %v297_v15 }
  0x3b   : > { %527 = vperm.xlu1 %1104, %v1337_v16   ;;  %522 = vperm.xlu0 %1103, %v1340_v17  }
  0x3d   : > { %994 = vmatpush3.xpose.msk.msra.mxu0 %vm303_vm1, %v297_v15  ;;  %1048 = vmatpush3.xpose.msk.msra.mxu1 %vm303_vm1, %v297_v15 }
  0x3e   : > { %995 = vmatprep.subr.msk.mxu0 %vm303_vm1, %v296_v18  ;;  %1033 = vmatprep.subr.msk.mxu1 %vm303_vm1, %v296_v18 }
  0x41   : > { %996 = vmatpush3.xpose.msk.msra.mxu0 %vm303_vm1, %v296_v18  ;;  %1049 = vmatpush3.xpose.msk.msra.mxu1 %vm303_vm1, %v296_v18 }
  0x42   : > { %997 = vmatprep.subr.msk.mxu0 %vm303_vm1, %v295_v19  ;;  %1034 = vmatprep.subr.msk.mxu1 %vm303_vm1, %v295_v19 }
  0x45   : > { %998 = vmatpush3.xpose.msk.msra.mxu0 %vm303_vm1, %v295_v19  ;;  %1050 = vmatpush3.xpose.msk.msra.mxu1 %vm303_vm1, %v295_v19 }
  0x46   : > { %999 = vmatprep.subr.msk.mxu0 %vm303_vm1, %v294_v20  ;;  %1035 = vmatprep.subr.msk.mxu1 %vm303_vm1, %v294_v20 }
  0x49   : > { %1000 = vmatpush3.xpose.msk.msra.mxu0 %vm303_vm1, %v294_v20  ;;  %1051 = vmatpush3.xpose.msk.msra.mxu1 %vm303_vm1, %v294_v20 }
  0x4a   : > { %1001 = vmatprep.subr.msk.mxu0 %vm303_vm1, %v293_v21  ;;  %1036 = vmatprep.subr.msk.mxu1 %vm303_vm1, %v293_v21 }
  0x4d   : > { %1002 = vmatpush3.xpose.msk.msra.mxu0 %vm303_vm1, %v293_v21  ;;  %1052 = vmatpush3.xpose.msk.msra.mxu1 %vm303_vm1, %v293_v21 }
  0x4e   : > { %1003 = vmatprep.subr.msk.mxu0 %vm303_vm1, %v292_v22  ;;  %1037 = vmatprep.subr.msk.mxu1 %vm303_vm1, %v292_v22 }
  0x51   : > { %1004 = vmatpush3.xpose.msk.msra.mxu0 %vm303_vm1, %v292_v22  ;;  %1053 = vmatpush3.xpose.msk.msra.mxu1 %vm303_vm1, %v292_v22 }
  0x52   : > { %1005 = vmatprep.subr.msk.mxu0 %vm303_vm1, %v291_v23  ;;  %1038 = vmatprep.subr.msk.mxu1 %vm303_vm1, %v291_v23 }
  0x55   : > { %1006 = vmatpush3.xpose.msk.msra.mxu0 %vm303_vm1, %v291_v23  ;;  %1054 = vmatpush3.xpose.msk.msra.mxu1 %vm303_vm1, %v291_v23 }
  0x56   : > { %1007 = vmatprep.subr.msk.mxu0 %vm303_vm1, %v290_v24  ;;  %1039 = vmatprep.subr.msk.mxu1 %vm303_vm1, %v290_v24 }
  0x59   : > { %1008 = vmatpush3.xpose.msk.msra.mxu0 %vm303_vm1, %v290_v24  ;;  %1055 = vmatpush3.xpose.msk.msra.mxu1 %vm303_vm1, %v290_v24 }
  0x5a   : > { %1009 = vmatprep.subr.msk.mxu0 %vm303_vm1, %v289_v25  ;;  %1040 = vmatprep.subr.msk.mxu1 %vm303_vm1, %v289_v25 }
  0x5d   : > { %1010 = vmatpush3.xpose.msk.msra.mxu0 %vm303_vm1, %v289_v25  ;;  %1056 = vmatpush3.xpose.msk.msra.mxu1 %vm303_vm1, %v289_v25 }
  0x5e   : > { %1011 = vmatprep.subr.msk.mxu0 %vm303_vm1, %v288_v26  ;;  %1041 = vmatprep.subr.msk.mxu1 %vm303_vm1, %v288_v26 }
  0x61   : > { %1012 = vmatpush3.xpose.msk.msra.mxu0 %vm303_vm1, %v288_v26  ;;  %1057 = vmatpush3.xpose.msk.msra.mxu1 %vm303_vm1, %v288_v26 }
  0x62   : > { %1013 = vmatprep.subr.msk.mxu0 %vm303_vm1, %v287_v27  ;;  %1042 = vmatprep.subr.msk.mxu1 %vm303_vm1, %v287_v27 }
  0x65   : > { %1014 = vmatpush3.xpose.msk.msra.mxu0 %vm303_vm1, %v287_v27  ;;  %1058 = vmatpush3.xpose.msk.msra.mxu1 %vm303_vm1, %v287_v27 }
  0x68   : > { %1016 = vmatmul.mubr.msk.f32.vlgmr.msra.gmra.mxu0 %vm303_vm1, %v280_v28  ;;  %1022 = vmatmul.mubr.msk.f32.vlgmr.msra.gmra.mxu1 %vm303_vm1, %v284_v29 }
  0x69   : > { %1018 = vmatprep.mubr.msk.f32.mxu0 %vm303_vm1, %v281_v30  ;;  %1024 = vmatprep.mubr.msk.f32.mxu1 %vm303_vm1, %v285_v31 }
  0x6c   : > { %1019 = vmatmul.mubr.msk.f32.gmra.mxu0 %vm303_vm1, %v282_v32  ;;  %1025 = vmatmul.mubr.msk.f32.gmra.mxu1 %vm303_vm1, %v286_v33 }
  0xaa   : > { %v503_v34 = vpop.permute.xlu1 %502  ;;  %v493_v35 = vpop.permute.xlu0 %492 }
  0xab   : > { %v536_v46 = vadd.f32 %v953_v40, %v493_v35  ;;  %v538_v59 = vadd.f32 %v953_v40, %v503_v34 }
  0xae   : > { %v508_v36 = vpop.permute.xlu1 %507  ;;  %v498_v37 = vpop.permute.xlu0 %497 }
  0xaf   : > { %v537_v41 = vadd.f32 %v953_v40, %v498_v37  ;;  %v539_v51 = vadd.f32 %v953_v40, %v508_v36 }
  0xb2   : > { %v518_v38 = vpop.permute.xlu1 %517  ;;  %v513_v39 = vpop.permute.xlu0 %512 }
  0xb3   : > { %v541_v42 = vadd.f32 %v953_v40, %v518_v38  ;;  %v540_v47 = vadd.f32 %v953_v40, %v513_v39 }
  0xb6   : > { %v528_v43 = vpop.permute.xlu1 %527  ;;  %v523_v48 = vpop.permute.xlu0 %522 }
  0xb7   : > { %v543_v52 = vadd.f32 %v953_v40, %v528_v43  ;;  %v542_v60 = vadd.f32 %v953_v40, %v523_v48 }
 0x128   : > { %v1017_v44 = vpop.f32.mrf.mxu0  ;;  %v1023_v45 = vpop.f32.mrf.mxu1 }
 0x129   : > { %v545_v49 = vadd.f32 %v1017_v44, %v537_v41  ;;  %v549_v50 = vadd.f32 %v1023_v45, %v541_v42 }
 0x12a   : > { %v442_v53 = vpop.f32.mrf.mxu0  ;;  %v462_v54 = vpop.f32.mrf.mxu1 }
 0x12b   : > { %v1418_v55 = vmax.f32 %v545_v49, 0.0  ;;  %v1420_v56 = vmax.f32 %v549_v50, 0.0  ;;  %v544_v57 = vadd.f32 %v536_v46, %v442_v53  ;;  %v548_v58 = vadd.f32 %v540_v47, %v462_v54 }
 0x12c   : > { %v1020_v61 = vpop.f32.mrf.mxu0  ;;  %v1026_v62 = vpop.f32.mrf.mxu1 }
 0x12d   : > { %v1422_v63 = vmax.f32 %v544_v57, 0.0  ;;  %v1424_v0 = vmax.f32 %v548_v58, 0.0  ;;  %v547_v1 = vadd.f32 %v1020_v61, %v539_v51  ;;  %v551_v2 = vadd.f32 %v1026_v62, %v543_v52  ;;  %564 = sbr.rel (%p954_p1) target bundleno = 619 (0x26b), region = 44 }
 0x12e   : > { %v452_v3 = vpop.f32.mrf.mxu0  ;;  %v472_v4 = vpop.f32.mrf.mxu1 }
 0x12f   : > { %v1426_v5 = vmax.f32 %v547_v1, 0.0  ;;  %v1428_v6 = vmax.f32 %v551_v2, 0.0  ;;  %v546_v7 = vadd.f32 %v538_v59, %v452_v3  ;;  %v550_v12 = vadd.f32 %v542_v60, %v472_v4 }
 0x131   : > { %v1430_v15 = vmax.f32 %v546_v7, 0.0  ;;  %v1432_v18 = vmax.f32 %v550_v12, 0.0 }
 0x132   : > { %v637_v19 = vsub.f32 1.0, %v1304_v9  ;;  %v1180_v20 = vmov 1   ;;  %v638_v21 = vsub.f32 1.0, %v1314_v11  ;;  %v639_v22 = vsub.f32 1.0, %v1301_v8 }
 0x133   : > { %1106 = vset.pattern.permute.xlu1 %v1180_v20  ;;  %1105 = vset.pattern.permute.xlu0 %v1180_v20  ;;  %v640_v23 = vsub.f32 1.0, %v1311_v10  ;;  %v641_v24 = vsub.f32 1.0, %v1327_v14  ;;  %1107 = vrsqrt.f32 %v1422_v63  ;;  %vm567_vm2 = vcmp.eq.f32.partialorder %v1422_v63, inf }
 0x134   : > { %702 = vperm.xlu1 %1106, %v1304_v9   ;;  %647 = vperm.xlu0 %1105, %v637_v19   ;;  %v642_v9 = vsub.f32 1.0, %v1324_v13  ;;  %1109 = vrsqrt.f32 %v1418_v55  ;;  %vm569_vm3 = vcmp.eq.f32.partialorder %v1422_v63, 0.0  ;;  %vm574_vm4 = vcmp.eq.f32.partialorder %v1418_v55, inf }
 0x135   : > { %1111 = vrsqrt.f32 %v1430_v15  ;;  %v577_v28 = vand.u32 2147483648, %v1418_v55  ;;  %vm576_vm5 = vcmp.eq.f32.partialorder %v1418_v55, 0.0  ;;  %vm581_vm6 = vcmp.eq.f32.partialorder %v1430_v15, inf }
 0x136   : > { %1113 = vrsqrt.f32 %v1426_v5  ;;  %v584_v33 = vand.u32 2147483648, %v1430_v15  ;;  %vm583_vm7 = vcmp.eq.f32.partialorder %v1430_v15, 0.0  ;;  %vm588_vm8 = vcmp.eq.f32.partialorder %v1426_v5, inf }
 0x137   : > { %1115 = vrsqrt.f32 %v1424_v0  ;;  %v591_v38 = vand.u32 2147483648, %v1426_v5  ;;  %vm590_vm9 = vcmp.eq.f32.partialorder %v1426_v5, 0.0  ;;  %vm595_vm10 = vcmp.eq.f32.partialorder %v1424_v0, inf }
 0x138   : > { %706 = vperm.xlu1 %1106, %v1314_v11   ;;  %652 = vperm.xlu0 %1105, %v638_v21   ;;  %v643_v11 = vsub.f32 1.0, %v1340_v17  ;;  %1117 = vrsqrt.f32 %v1420_v56  ;;  %vm597_vm11 = vcmp.eq.f32.partialorder %v1424_v0, 0.0  ;;  %v598_v46 = vand.u32 2147483648, %v1424_v0 }
 0x139   : > { %1119 = vrsqrt.f32 %v1432_v18  ;;  %vm602_vm12 = vcmp.eq.f32.partialorder %v1420_v56, inf  ;;  %v605_v52 = vand.u32 2147483648, %v1420_v56  ;;  %vm604_vm13 = vcmp.eq.f32.partialorder %v1420_v56, 0.0 }
 0x13a   : > { %1121 = vrsqrt.f32 %v1428_v6  ;;  %vm609_vm14 = vcmp.eq.f32.partialorder %v1432_v18, inf  ;;  %vm611_vm15 = vcmp.eq.f32.partialorder %v1432_v18, 0.0  ;;  %vm616_vm0 = vcmp.eq.f32.partialorder %v1428_v6, inf }
 0x13b   : > { %vm618_vm1 = vcmp.eq.f32.partialorder %v1428_v6, 0.0 }
 0x13c   : > { %710 = vperm.xlu1 %1106, %v1301_v8   ;;  %657 = vperm.xlu0 %1105, %v639_v22   ;;  %v644_v8 = vsub.f32 1.0, %v1337_v16 }
 0x140   : > { %714 = vperm.xlu1 %1106, %v1311_v10   ;;  %662 = vperm.xlu0 %1105, %v640_v23   ;;  %v1108_v10 = vpop.eup %1107 }
 0x144   : > { %718 = vperm.xlu1 %1106, %v1327_v14   ;;  %667 = vperm.xlu0 %1105, %v641_v24   ;;  %v1110_v14 = vpop.eup %1109 }
 0x145   : > { %v573_v26 = vmul.f32 %v1110_v14, %v1418_v55 }
 0x147   : > { %v575_v31 = vsel %vm574_vm4, %v1418_v55, %v573_v26 }
 0x148   : > { %722 = vperm.xlu1 %1106, %v1324_v13   ;;  %672 = vperm.xlu0 %1105, %v642_v9   ;;  %v566_v13 = vmul.f32 %v1108_v10, %v1422_v63  ;;  %v578_v35 = vsel %vm576_vm5, %v577_v28, %v575_v31 }
 0x149   : > { %v622_v41 = vsub.f32 2.0, %v578_v35 }
 0x14a   : > { %v568_v25 = vsel %vm567_vm2, %v1422_v63, %v566_v13  ;;  %vm780_vm2 = vcmask 0  }
 0x14b   : > { %v630_v49 = vmax.f32 %v622_v41, 0.0 }
 0x14c   : > { %726 = vperm.xlu1 %1106, %v1340_v17   ;;  %677 = vperm.xlu0 %1105, %v643_v11   ;;  %v1112_v17 = vpop.eup %1111  ;;  %v612_v11 = vand.u32 2147483648, %v1432_v18 }
 0x14d   : > { %v580_v29 = vmul.f32 %v1112_v17, %v1430_v15  ;;  %v1114_v30 = vpop.eup %1113  ;;  %v694_v1 = vmul.f32 %v630_v49, %v630_v49 }
 0x14e   : > { %v1116_v34 = vpop.eup %1115  ;;  %v587_v37 = vmul.f32 %v1114_v30, %v1426_v5  ;;  %v619_v30 = vand.u32 2147483648, %v1428_v6 }
 0x14f   : > { %v582_v36 = vsel %vm581_vm6, %v1430_v15, %v580_v29  ;;  %v1118_v39 = vpop.eup %1117  ;;  %v594_v43 = vmul.f32 %v1116_v34, %v1424_v0 }
 0x150   : > { %730 = vperm.xlu1 %1106, %v1337_v16   ;;  %682 = vperm.xlu0 %1105, %v644_v8   ;;  %v570_v16 = vand.u32 2147483648, %v1422_v63  ;;  %v585_v42 = vsel %vm583_vm7, %v584_v33, %v582_v36  ;;  %v589_v44 = vsel %vm588_vm8, %v1426_v5, %v587_v37  ;;  %v601_v47 = vmul.f32 %v1118_v39, %v1420_v56  ;;  %v1120_v53 = vpop.eup %1119 }
 0x151   : > { %v623_v45 = vsub.f32 2.0, %v585_v42  ;;  %v592_v50 = vsel %vm590_vm9, %v591_v38, %v589_v44  ;;  %v596_v51 = vsel %vm595_vm10, %v1424_v0, %v594_v43  ;;  %v608_v4 = vmul.f32 %v1120_v53, %v1432_v18  ;;  %v1122_v7 = vpop.eup %1121 }
 0x152   : > { %v571_v27 = vsel %vm569_vm3, %v570_v16, %v568_v25  ;;  %v624_v58 = vsub.f32 2.0, %v592_v50  ;;  %v599_v59 = vsel %vm597_vm11, %v598_v46, %v596_v51  ;;  %v603_v60 = vsel %vm602_vm12, %v1420_v56, %v601_v47 }
 0x153   : > { %v621_v32 = vsub.f32 2.0, %v571_v27  ;;  %v631_v2 = vmax.f32 %v623_v45, 0.0  ;;  %v625_v20 = vsub.f32 2.0, %v599_v59  ;;  %v606_v21 = vsel %vm604_vm13, %v605_v52, %v603_v60 }
 0x154   : > { %v632_v9 = vmax.f32 %v624_v58, 0.0  ;;  %v610_v10 = vsel %vm609_vm14, %v1432_v18, %v608_v4  ;;  %v615_v13 = vmul.f32 %v1122_v7, %v1428_v6  ;;  %v626_v17 = vsub.f32 2.0, %v606_v21 }
 0x155   : > { %v629_v40 = vmax.f32 %v621_v32, 0.0  ;;  %v695_v24 = vmul.f32 %v631_v2, %v631_v2  ;;  %v633_v28 = vmax.f32 %v625_v20, 0.0  ;;  %v613_v29 = vsel %vm611_vm15, %v612_v11, %v610_v10 }
 0x156   : > { %v696_v27 = vmul.f32 %v632_v9, %v632_v9  ;;  %v617_v32 = vsel %vm616_vm0, %v1428_v6, %v615_v13  ;;  %v634_v35 = vmax.f32 %v626_v17, 0.0  ;;  %v627_v39 = vsub.f32 2.0, %v613_v29 }
 0x157   : > { %v693_v48 = vmul.f32 %v629_v40, %v629_v40  ;;  %v697_v38 = vmul.f32 %v633_v28, %v633_v28  ;;  %v620_v40 = vsel %vm618_vm1, %v619_v30, %v617_v32  ;;  %v765_v32 = vld [vmem:[#allocation2] sm:$0x1] }
 0x158   : > { %v698_v44 = vmul.f32 %v634_v35, %v634_v35  ;;  %v635_v47 = vmax.f32 %v627_v39, 0.0 }
 0x1af   : > { %v703_v54 = vpop.permute.xlu1 %702  ;;  %v648_v57 = vpop.permute.xlu0 %647 }
 0x1b0   : > { %v733_v61 = vmul.f32 %v703_v54, %v693_v48  ;;  %v685_v62 = vmul.f32 %v648_v57, %v1422_v63  ;;  %v628_v48 = vsub.f32 2.0, %v620_v40  ;;  %v699_v54 = vmul.f32 %v635_v47, %v635_v47 }
 0x1b2   : > { %v741_v3 = vadd.f32 %v733_v61, %v685_v62  ;;  %v636_v57 = vmax.f32 %v628_v48, 0.0 }
 0x1b3   : > { %v707_v12 = vpop.permute.xlu1 %706  ;;  %v653_v19 = vpop.permute.xlu0 %652 }
 0x1b4   : > { %v734_v22 = vmul.f32 %v707_v12, %v694_v1  ;;  %v686_v23 = vmul.f32 %v653_v19, %v1418_v55  ;;  %749 = vadd.xlane.f32.xlu0 %v741_v3  ;;  %v700_v1 = vmul.f32 %v636_v57, %v636_v57 }
 0x1b6   : > { %v742_v8 = vadd.f32 %v734_v22, %v686_v23 }
 0x1b7   : > { %v711_v14 = vpop.permute.xlu1 %710  ;;  %v658_v16 = vpop.permute.xlu0 %657 }
 0x1b8   : > { %v735_v25 = vmul.f32 %v711_v14, %v695_v24  ;;  %v687_v26 = vmul.f32 %v658_v16, %v1430_v15  ;;  %751 = vadd.xlane.f32.xlu1 %v742_v8 }
 0x1ba   : > { %v743_v31 = vadd.f32 %v735_v25, %v687_v26 }
 0x1bb   : > { %v715_v33 = vpop.permute.xlu1 %714  ;;  %v663_v34 = vpop.permute.xlu0 %662 }
 0x1bc   : > { %v736_v36 = vmul.f32 %v715_v33, %v696_v27  ;;  %v688_v37 = vmul.f32 %v663_v34, %v1426_v5  ;;  %753 = vadd.xlane.f32.xlu0 %v743_v31 }
 0x1be   : > { %v744_v41 = vadd.f32 %v736_v36, %v688_v37 }
 0x1bf   : > { %v719_v42 = vpop.permute.xlu1 %718  ;;  %v668_v43 = vpop.permute.xlu0 %667 }
 0x1c0   : > { %v737_v45 = vmul.f32 %v719_v42, %v697_v38  ;;  %v689_v46 = vmul.f32 %v668_v43, %v1424_v0  ;;  %755 = vadd.xlane.f32.xlu0 %v744_v41 }
 0x1c2   : > { %v745_v49 = vadd.f32 %v737_v45, %v689_v46 }
 0x1c3   : > { %v723_v50 = vpop.permute.xlu1 %722  ;;  %v673_v51 = vpop.permute.xlu0 %672 }
 0x1c4   : > { %v738_v52 = vmul.f32 %v723_v50, %v698_v44  ;;  %v690_v53 = vmul.f32 %v673_v51, %v1420_v56  ;;  %757 = vadd.xlane.f32.xlu1 %v745_v49 }
 0x1c6   : > { %v746_v58 = vadd.f32 %v738_v52, %v690_v53 }
 0x1c7   : > { %v727_v59 = vpop.permute.xlu1 %726  ;;  %v678_v60 = vpop.permute.xlu0 %677 }
 0x1c8   : > { %v739_v61 = vmul.f32 %v727_v59, %v699_v54  ;;  %v691_v62 = vmul.f32 %v678_v60, %v1432_v18  ;;  %759 = vadd.xlane.f32.xlu0 %v746_v58 }
 0x1ca   : > { %v747_v2 = vadd.f32 %v739_v61, %v691_v62 }
 0x1cb   : > { %v731_v3 = vpop.permute.xlu1 %730  ;;  %v683_v4 = vpop.permute.xlu0 %682 }
 0x1cc   : > { %v740_v7 = vmul.f32 %v731_v3, %v700_v1  ;;  %v692_v12 = vmul.f32 %v683_v4, %v1428_v6  ;;  %761 = vadd.xlane.f32.xlu1 %v747_v2 }
 0x1ce   : > { %v748_v19 = vadd.f32 %v740_v7, %v692_v12 }
 0x1d0   : > { %763 = vadd.xlane.f32.xlu0 %v748_v19 }
 0x23d   : > { %v750_v20 = vpop.xlane.xlu0 %749 }
 0x241   : > { %v752_v22 = vpop.xlane.xlu1 %751 }
 0x242   : > { %v766_v23 = vadd.f32 %v752_v22, %v750_v20 }
 0x245   : > { %v754_v21 = vpop.xlane.xlu0 %753 }
 0x246   : > { %v767_v9 = vadd.f32 %v766_v23, %v754_v21 }
 0x249   : > { %v756_v24 = vpop.xlane.xlu0 %755 }
 0x24a   : > { %v768_v8 = vadd.f32 %v767_v9, %v756_v24 }
 0x24d   : > { %v758_v11 = vpop.xlane.xlu1 %757 }
 0x24e   : > { %v769_v13 = vadd.f32 %v768_v8, %v758_v11 }
 0x251   : > { %v760_v10 = vpop.xlane.xlu0 %759 }
 0x252   : > { %v770_v16 = vadd.f32 %v769_v13, %v760_v10 }
 0x255   : > { %v762_v14 = vpop.xlane.xlu1 %761 }
 0x256   : > { %v771_v17 = vadd.f32 %v770_v16, %v762_v14 }
 0x259   : > { %v764_v25 = vpop.xlane.xlu0 %763 }
 0x25a   : > { %v772_v26 = vadd.f32 %v771_v17, %v764_v25 }
 0x25c   : > { %v773_v27 = vrot.slane %v772_v26, 4 }
 0x25e   : > { %v774_v28 = vadd.f32 %v773_v27, %v772_v26 }
 0x260   : > { %v775_v29 = vrot.slane %v774_v28, 2 }
 0x262   : > { %v776_v30 = vadd.f32 %v775_v29, %v774_v28 }
 0x264   : > { %v777_v31 = vrot.slane %v776_v30, 1 }
 0x266   : > { %v778_v33 = vadd.f32 %v777_v31, %v776_v30 }
 0x268   : > { %v779_v34 = vadd.f32 %v778_v33, %v765_v32 }
 0x26a   : > { %781 = vst.msk [vmem:[#allocation2] sm:$0x1] %vm780_vm2, %v779_v34 }
 0x26b PF: > { %p955_p2 = scmp.ne.s32.totalorder %s1411_s6, 0 }
 0x26d   : > { %785 = sbr.rel (%p955_p2) target bundleno = 797 (0x31d), region = 48 }
 0x272   : > { %786 = vadd.xlane.f32.xlu0 %v1422_v63  ;;  %790 = vadd.xlane.f32.xlu1 %v1430_v15  ;;  %v802_v47 = vld [vmem:[#allocation2] sm:$0x1]  ;;  %vm817_vm3 = vcmask 0  }
 0x276   : > { %788 = vadd.xlane.f32.xlu0 %v1418_v55  ;;  %792 = vadd.xlane.f32.xlu1 %v1426_v5 }
 0x27a   : > { %794 = vadd.xlane.f32.xlu0 %v1424_v0  ;;  %796 = vadd.xlane.f32.xlu1 %v1420_v56 }
 0x27e   : > { %798 = vadd.xlane.f32.xlu0 %v1432_v18  ;;  %800 = vadd.xlane.f32.xlu1 %v1428_v6 }
 0x2fb   : > { %v787_v35 = vpop.xlane.xlu0 %786  ;;  %v791_v36 = vpop.xlane.xlu1 %790 }
 0x2ff   : > { %v789_v37 = vpop.xlane.xlu0 %788  ;;  %v793_v38 = vpop.xlane.xlu1 %792 }
 0x300   : > { %v803_v39 = vadd.f32 %v789_v37, %v787_v35 }
 0x302   : > { %v804_v63 = vadd.f32 %v803_v39, %v791_v36 }
 0x303   : > { %v795_v40 = vpop.xlane.xlu0 %794  ;;  %v797_v15 = vpop.xlane.xlu1 %796 }
 0x304   : > { %v805_v41 = vadd.f32 %v804_v63, %v793_v38 }
 0x306   : > { %v806_v55 = vadd.f32 %v805_v41, %v795_v40 }
 0x307   : > { %v799_v42 = vpop.xlane.xlu0 %798  ;;  %v801_v43 = vpop.xlane.xlu1 %800 }
 0x308   : > { %v807_v5 = vadd.f32 %v806_v55, %v797_v15 }
 0x30a   : > { %v808_v0 = vadd.f32 %v807_v5, %v799_v42 }
 0x30c   : > { %v809_v44 = vadd.f32 %v808_v0, %v801_v43 }
 0x30e   : > { %v810_v56 = vrot.slane %v809_v44, 4 }
 0x310   : > { %v811_v45 = vadd.f32 %v810_v56, %v809_v44 }
 0x312   : > { %v812_v18 = vrot.slane %v811_v45, 2 }
 0x314   : > { %v813_v46 = vadd.f32 %v812_v18, %v811_v45 }
 0x316   : > { %v814_v6 = vrot.slane %v813_v46, 1 }
 0x318   : > { %v815_v48 = vadd.f32 %v814_v6, %v813_v46 }
 0x31a   : > { %v816_v49 = vadd.f32 %v815_v48, %v802_v47 }
 0x31c   : > { %818 = vst.msk [vmem:[#allocation2] sm:$0x1] %vm817_vm3, %v816_v49 }
 0x31d PF: > { %p956_p3 = scmp.ne.s32.totalorder %s1159_s23, 2 }
 0x31f   : > { %822 = sbr.rel (%p956_p3) target bundleno = 806 (0x326), region = 52 }
 0x324   : > { %v823_v50 = vld [vmem:[#allocation2] sm:$0x1]  ;;  %vm824_vm4 = vcmask 0  }
 0x325   : > { %825 = vst.msk [vmem:[%s272_s30] sm:$0x1] %vm824_vm4, %v823_v50 }
 0x326 PF: > { %s21_s26 = sadd.s32 1, %s1175_s26   ;;  %s1543_s23 = smov %s1167_s25 }
 0x327   : > { %p18_p4 = scmp.ge.s32.totalorder %s21_s26, 11   ;;  %s1544_s24 = smov %s1171_s0 }
 0x328   : > { %s1545_s25 = smov %s1548_s27  ;;  %s1546_s0 = smov %s1552_s28 }
 0x329   :  { %20 = sbr.rel (!%p18_p4) target bundleno = 18 (0x12), region = 91 }

</bundles_post_ra>
